<compile_context>
chip_gen: v6e
topology: v6e:2x2x1
jax: 0.10.0
libtpu: 0.0.40
codegen_flags: <defaults>
</compile_context>

<pallas_src>
import jax
import jax.numpy as jnp
from jax.experimental import pallas as pl
from jax.experimental.pallas import tpu as pltpu

_EPS = 1e-8  # torch.nn.functional.cosine_similarity default eps


# --------------------------------------------------------------------------- #
# Kernel
# --------------------------------------------------------------------------- #
def _make_kernel(D, td):
    """Build the kernel for feature size D and lane-block size td (static)."""
    lane_chunk = min(td, 128)          # accumulator lane width
    n_chunks = td // lane_chunk        # exact: td == D (<=128) or td % 128 == 0
    mask_lanes = (D % td) != 0         # last k-block has lanes beyond D

    def kernel(x1_ref, x2_ref, o_ref, dot_acc, n1_acc, n2_acc):
        k = pl.program_id(1)

        @pl.when(k == 0)
        def _init():
            dot_acc[...] = jnp.zeros_like(dot_acc)
            n1_acc[...] = jnp.zeros_like(n1_acc)
            n2_acc[...] = jnp.zeros_like(n2_acc)

        tb_blk = x1_ref.shape[0]
        if mask_lanes:
            lane = jax.lax.broadcasted_iota(jnp.int32, (tb_blk, lane_chunk), 1)
            limit = D - k * td  # valid lanes remaining in this k-block

        # Lane-partial accumulation: plain VALU adds of 128-lane chunks; the
        # cross-lane reduction is deferred to the single finalize step.
        dot_p = n1_p = n2_p = None
        for c in range(n_chunks):
            lo = c * lane_chunk
            a = x1_ref[:, lo:lo + lane_chunk].astype(jnp.float32)
            b = x2_ref[:, lo:lo + lane_chunk].astype(jnp.float32)
            if mask_lanes:
                valid = lane < (limit - lo)
                a = jnp.where(valid, a, 0.0)
                b = jnp.where(valid, b, 0.0)
            if c == 0:
                dot_p, n1_p, n2_p = a * b, a * a, b * b
            else:
                dot_p = dot_p + a * b
                n1_p = n1_p + a * a
                n2_p = n2_p + b * b

        dot_acc[...] += dot_p
        n1_acc[...] += n1_p
        n2_acc[...] += n2_p

        @pl.when(k == pl.num_programs(1) - 1)
        def _finalize():
            dot = jnp.sum(dot_acc[...], axis=1, keepdims=True)   # (tb, 1)
            n1s = jnp.sum(n1_acc[...], axis=1, keepdims=True)
            n2s = jnp.sum(n2_acc[...], axis=1, keepdims=True)
            # ATen clamps the norm *product*: dot / max(||x1||*||x2||, eps).
            denom = jnp.maximum(jnp.sqrt(n1s * n2s), _EPS)
            o_ref[...] = (1.0 - dot / denom).astype(o_ref.dtype)

    return kernel


# --------------------------------------------------------------------------- #
# Tiling / VMEM budgeting
# --------------------------------------------------------------------------- #
def _round_up(x, m):
    return ((x + m - 1) // m) * m


def _cdiv(a, b):
    return -(-a // b)


def _vmem_capacity_bytes():
    try:
        info = pltpu.get_tpu_info()
        cap = getattr(info, "vmem_capacity_bytes", None)
        if cap:
            return int(cap)
    except Exception:
        pass
    return 64 * 1024 * 1024  # conservative: v7x per-TC VMEM


def _is_v7x():
    try:
        kind = str(jax.devices()[0].device_kind).lower()
    except Exception:
        return False
    return ("v7" in kind) or ("7x" in kind)


# Per-row lane-padded fixed VMEM cost (f32, 128 lanes):
#   3 accumulators + 2 output pipeline buffers + ~6 per-chunk temporaries.
_PER_ROW_FIXED = 11 * 128 * 4


def _choose_tiles(B, D, itemsize, budget, two_core, max_rows_per_tile=None):
    """Pick (tb, td): 2 inputs x 2 pipeline buffers + accumulators fit `budget`."""
    # ---- feature (lane) tile: full D if <=128, else lane-aligned chunks <= D ----
    if D <= 128:
        td = D
    else:
        min_rows = max(8, min(_round_up(B, 8), 256))
        max_td = (budget // min_rows - _PER_ROW_FIXED) // (4 * itemsize)
        max_td = max(128, (max_td // 128) * 128)
        td_hi = max(128, min(max_td, (D // 128) * 128))
        nk = _cdiv(D, td_hi)
        td = min(td_hi, _round_up(_cdiv(D, nk), 128))   # balanced chunks

    # ---- batch (sublane) tile: sized by bytes, no row cap ----
    bytes_per_row = 4 * itemsize * td + _PER_ROW_FIXED
    tb_max = max(8, (budget // bytes_per_row) // 8 * 8)
    if max_rows_per_tile is not None:
        tb_max = max(8, min(tb_max, (max_rows_per_tile // 8) * 8))

    if B <= tb_max:
        if two_core and B >= 16:
            tb = _round_up(_cdiv(B, 2), 8)   # 2 tiles -> both v7x TensorCores
        else:
            tb = B                            # single tile (block == full dim)
    else:
        nb = _cdiv(B, tb_max)
        if two_core and (nb % 2):
            nb += 1                           # even tile count across 2 TCs
        tb = _round_up(_cdiv(B, nb), 8)
    return tb, td


# --------------------------------------------------------------------------- #
# Wrapper
# --------------------------------------------------------------------------- #
def cosine_distance(x1, x2, max_rows_per_tile=None):
    """Batch-wise cosine distance: 1 - cosine_similarity(x1, x2, dim=1)."""
    assert x1.shape == x2.shape, "x1 and x2 must have the same shape"
    assert x1.ndim == 2, "expected batches of row vectors, shape (B, D)"
    B, D = x1.shape
    itemsize = jnp.dtype(x1.dtype).itemsize

    vmem_cap = _vmem_capacity_bytes()
    vmem_limit = int(vmem_cap * 0.8)               # ~51 MiB v7x, ~102 MiB v5e/v6e
    budget = vmem_limit - 2 * 1024 * 1024          # slack for compiler internals

    tb, td = _choose_tiles(B, D, itemsize, budget, _is_v7x(), max_rows_per_tile)
    nb = _cdiv(B, tb)
    nk = _cdiv(D, td)
    lane_w = min(td, 128)

    cost = pl.CostEstimate(
        flops=6 * B * D,
        transcendentals=B,
        bytes_accessed=2 * B * D * itemsize + B * 4,
    )

    out = pl.pallas_call(
        _make_kernel(D, td),
        out_shape=jax.ShapeDtypeStruct((B, 1), jnp.float32),
        grid_spec=pltpu.PrefetchScalarGridSpec(
            num_scalar_prefetch=0,
            grid=(nb, nk),
            in_specs=[
                pl.BlockSpec((tb, td), lambda i, k: (i, k)),
                pl.BlockSpec((tb, td), lambda i, k: (i, k)),
            ],
            out_specs=pl.BlockSpec((tb, 1), lambda i, k: (i, 0)),
            scratch_shapes=[
                pltpu.VMEM((tb, lane_w), jnp.float32),  # lane-partial dot
                pltpu.VMEM((tb, lane_w), jnp.float32),  # lane-partial ||x1||^2
                pltpu.VMEM((tb, lane_w), jnp.float32),  # lane-partial ||x2||^2
            ],
        ),
        compiler_params=pltpu.CompilerParams(
            dimension_semantics=("parallel", "arbitrary"),
            vmem_limit_bytes=vmem_limit,
        ),
        cost_estimate=cost,
    )(x1, x2)

    # (B, 1) has the same contiguous HBM layout as (B,): reshape is free.
    return out[:, 0]


# --------------------------------------------------------------------------- #
# Reference + tests
# --------------------------------------------------------------------------- #
def _reference(x1, x2):
    x1 = x1.astype(jnp.float32)
    x2 = x2.astype(jnp.float32)
    dot = jnp.sum(x1 * x2, axis=1)
    n1 = jnp.sqrt(jnp.sum(x1 * x1, axis=1))
    n2 = jnp.sqrt(jnp.sum(x2 * x2, axis=1))
    return 1.0 - dot / jnp.maximum(n1 * n2, _EPS)


if __name__ == "__main__":
    key = jax.random.PRNGKey(0)
    k1, k2, k3, k4 = jax.random.split(key, 4)

    # Small deterministic example consistent with the module: batch=8, hidden=32.
    B, D = 8, 32
    x1 = jax.random.normal(k1, (B, D), dtype=jnp.float32)
    x2 = jax.random.normal(k2, (B, D), dtype=jnp.float32)
    out = cosine_distance(x1, x2)
    jax.block_until_ready(out)
    ref = _reference(x1, x2)
    assert out.shape == (B,)
    assert jnp.allclose(out, ref, atol=1e-5, rtol=1e-5)

    # Ragged shape: D=200 -> split feature axis with in-kernel lane masking.
    B2, D2 = 300, 200
    y1 = jax.random.normal(k3, (B2, D2), dtype=jnp.float32)
    y2 = jax.random.normal(k4, (B2, D2), dtype=jnp.float32)
    out2 = cosine_distance(y1, y2)
    jax.block_until_ready(out2)
    ref2 = _reference(y1, y2)
    assert out2.shape == (B2,)
    assert jnp.allclose(out2, ref2, atol=1e-5, rtol=1e-5)

    # Same data, forcing small batch tiles: exercises the partial last batch
    # block (un-padded cdiv grid) on any chip.
    out3 = cosine_distance(y1, y2, max_rows_per_tile=128)
    jax.block_until_ready(out3)
    assert jnp.allclose(out3, ref2, atol=1e-5, rtol=1e-5)

    print("KERNEL_OK")
</pallas_src>

<mosaic_0001>
module attributes {stable_mosaic.version = 11 : i64} {
  func.func @kernel(%arg0: i32, %arg1: i32, %arg2: memref<8x32xf32, #tpu.memory_space<vmem>>, %arg3: memref<8x32xf32, #tpu.memory_space<vmem>>, %arg4: memref<8x1xf32, #tpu.memory_space<vmem>>, %arg5: memref<8x32xf32, #tpu.memory_space<vmem>>, %arg6: memref<8x32xf32, #tpu.memory_space<vmem>>, %arg7: memref<8x32xf32, #tpu.memory_space<vmem>>) attributes {dimension_semantics = [#tpu.dimension_semantics<parallel>, #tpu.dimension_semantics<arbitrary>], iteration_bounds = array<i64: 1, 1>, scalar_prefetch = 0 : i64, scratch_operands = 3 : i64, tpu.core_type = #tpu.core_type<tc>, window_params = [{transform_indices = @transform_0, window_bounds = array<i64: 8, 32>}, {transform_indices = @transform_1, window_bounds = array<i64: 8, 32>}, {transform_indices = @transform_2, window_bounds = array<i64: 8, 1>}]} {
    %c0_i32 = arith.constant 0 : i32
    %0 = arith.cmpi eq, %arg1, %c0_i32 : i32
    %1 = arith.extui %0 : i1 to i32
    %c0_i32_0 = arith.constant 0 : i32
    %2 = arith.cmpi ne, %1, %c0_i32_0 : i32
    scf.if %2 {
      %cst = arith.constant 0.000000e+00 : f32
      %20 = vector.broadcast %cst : f32 to vector<8x32xf32>
      %c0_18 = arith.constant 0 : index
      %c0_19 = arith.constant 0 : index
      %21 = vector.load %arg5[%c0_18, %c0_19] : memref<8x32xf32, #tpu.memory_space<vmem>>, vector<8x32xf32>
      tpu.vector_store %arg5[%c0_18, %c0_19], %20 {strides = array<i32>} : memref<8x32xf32, #tpu.memory_space<vmem>>, vector<8x32xf32>,
      %cst_20 = arith.constant 0.000000e+00 : f32
      %22 = vector.broadcast %cst_20 : f32 to vector<8x32xf32>
      %c0_21 = arith.constant 0 : index
      %c0_22 = arith.constant 0 : index
      %23 = vector.load %arg6[%c0_21, %c0_22] : memref<8x32xf32, #tpu.memory_space<vmem>>, vector<8x32xf32>
      tpu.vector_store %arg6[%c0_21, %c0_22], %22 {strides = array<i32>} : memref<8x32xf32, #tpu.memory_space<vmem>>, vector<8x32xf32>,
      %cst_23 = arith.constant 0.000000e+00 : f32
      %24 = vector.broadcast %cst_23 : f32 to vector<8x32xf32>
      %c0_24 = arith.constant 0 : index
      %c0_25 = arith.constant 0 : index
      %25 = vector.load %arg7[%c0_24, %c0_25] : memref<8x32xf32, #tpu.memory_space<vmem>>, vector<8x32xf32>
      tpu.vector_store %arg7[%c0_24, %c0_25], %24 {strides = array<i32>} : memref<8x32xf32, #tpu.memory_space<vmem>>, vector<8x32xf32>,
    } else {
    }
    %c0 = arith.constant 0 : index
    %c0_1 = arith.constant 0 : index
    %3 = vector.load %arg2[%c0, %c0_1] : memref<8x32xf32, #tpu.memory_space<vmem>>, vector<8x32xf32>
    %c0_2 = arith.constant 0 : index
    %c0_3 = arith.constant 0 : index
    %4 = vector.load %arg3[%c0_2, %c0_3] : memref<8x32xf32, #tpu.memory_space<vmem>>, vector<8x32xf32>
    %5 = arith.mulf %3, %4 : vector<8x32xf32>
    %6 = arith.mulf %3, %3 : vector<8x32xf32>
    %7 = arith.mulf %4, %4 : vector<8x32xf32>
    %c0_4 = arith.constant 0 : index
    %c0_5 = arith.constant 0 : index
    %8 = vector.load %arg5[%c0_4, %c0_5] : memref<8x32xf32, #tpu.memory_space<vmem>>, vector<8x32xf32>
    %9 = arith.addf %8, %5 : vector<8x32xf32>
    %c0_6 = arith.constant 0 : index
    %c0_7 = arith.constant 0 : index
    %10 = vector.load %arg5[%c0_6, %c0_7] : memref<8x32xf32, #tpu.memory_space<vmem>>, vector<8x32xf32>
    tpu.vector_store %arg5[%c0_6, %c0_7], %9 {strides = array<i32>} : memref<8x32xf32, #tpu.memory_space<vmem>>, vector<8x32xf32>,
    %c0_8 = arith.constant 0 : index
    %c0_9 = arith.constant 0 : index
    %11 = vector.load %arg6[%c0_8, %c0_9] : memref<8x32xf32, #tpu.memory_space<vmem>>, vector<8x32xf32>
    %12 = arith.addf %11, %6 : vector<8x32xf32>
    %c0_10 = arith.constant 0 : index
    %c0_11 = arith.constant 0 : index
    %13 = vector.load %arg6[%c0_10, %c0_11] : memref<8x32xf32, #tpu.memory_space<vmem>>, vector<8x32xf32>
    tpu.vector_store %arg6[%c0_10, %c0_11], %12 {strides = array<i32>} : memref<8x32xf32, #tpu.memory_space<vmem>>, vector<8x32xf32>,
    %c0_12 = arith.constant 0 : index
    %c0_13 = arith.constant 0 : index
    %14 = vector.load %arg7[%c0_12, %c0_13] : memref<8x32xf32, #tpu.memory_space<vmem>>, vector<8x32xf32>
    %15 = arith.addf %14, %7 : vector<8x32xf32>
    %c0_14 = arith.constant 0 : index
    %c0_15 = arith.constant 0 : index
    %16 = vector.load %arg7[%c0_14, %c0_15] : memref<8x32xf32, #tpu.memory_space<vmem>>, vector<8x32xf32>
    tpu.vector_store %arg7[%c0_14, %c0_15], %15 {strides = array<i32>} : memref<8x32xf32, #tpu.memory_space<vmem>>, vector<8x32xf32>,
    %c0_i32_16 = arith.constant 0 : i32
    %17 = arith.cmpi eq, %arg1, %c0_i32_16 : i32
    %18 = arith.extui %17 : i1 to i32
    %c0_i32_17 = arith.constant 0 : i32
    %19 = arith.cmpi ne, %18, %c0_i32_17 : i32
    scf.if %19 {
      %c0_18 = arith.constant 0 : index
      %c0_19 = arith.constant 0 : index
      %20 = vector.load %arg5[%c0_18, %c0_19] : memref<8x32xf32, #tpu.memory_space<vmem>>, vector<8x32xf32>
      %cst = arith.constant dense<0.000000e+00> : vector<8xf32>
      %21 = vector.multi_reduction <add>, %20, %cst [1] : vector<8x32xf32> to vector<8xf32>
      %22 = vector.shape_cast %21 : vector<8xf32> to vector<8x1xf32>
      %c0_20 = arith.constant 0 : index
      %c0_21 = arith.constant 0 : index
      %23 = vector.load %arg6[%c0_20, %c0_21] : memref<8x32xf32, #tpu.memory_space<vmem>>, vector<8x32xf32>
      %cst_22 = arith.constant dense<0.000000e+00> : vector<8xf32>
      %24 = vector.multi_reduction <add>, %23, %cst_22 [1] : vector<8x32xf32> to vector<8xf32>
      %25 = vector.shape_cast %24 : vector<8xf32> to vector<8x1xf32>
      %c0_23 = arith.constant 0 : index
      %c0_24 = arith.constant 0 : index
      %26 = vector.load %arg7[%c0_23, %c0_24] : memref<8x32xf32, #tpu.memory_space<vmem>>, vector<8x32xf32>
      %cst_25 = arith.constant dense<0.000000e+00> : vector<8xf32>
      %27 = vector.multi_reduction <add>, %26, %cst_25 [1] : vector<8x32xf32> to vector<8xf32>
      %28 = vector.shape_cast %27 : vector<8xf32> to vector<8x1xf32>
      %29 = arith.mulf %25, %28 : vector<8x1xf32>
      %30 = math.sqrt %29 : vector<8x1xf32>
      %cst_26 = arith.constant 9.99999993E-9 : f32
      %31 = vector.broadcast %cst_26 : f32 to vector<8x1xf32>
      %32 = arith.maximumf %30, %31 : vector<8x1xf32>
      %33 = arith.divf %22, %32 : vector<8x1xf32>
      %cst_27 = arith.constant 1.000000e+00 : f32
      %34 = vector.broadcast %cst_27 : f32 to vector<8x1xf32>
      %35 = arith.subf %34, %33 : vector<8x1xf32>
      %c0_28 = arith.constant 0 : index
      %c0_29 = arith.constant 0 : index
      %36 = vector.load %arg4[%c0_28, %c0_29] : memref<8x1xf32, #tpu.memory_space<vmem>>, vector<8x1xf32>
      tpu.vector_store %arg4[%c0_28, %c0_29], %35 {strides = array<i32>} : memref<8x1xf32, #tpu.memory_space<vmem>>, vector<8x1xf32>,
    } else {
    }
    return
  }
  func.func @transform_0(%arg0: i32, %arg1: i32) -> (i32, i32) {
    %c0_i32 = arith.constant 0 : i32
    return %arg0, %arg1 : i32, i32
  }
  func.func @transform_1(%arg0: i32, %arg1: i32) -> (i32, i32) {
    %c0_i32 = arith.constant 0 : i32
    return %arg0, %arg1 : i32, i32
  }
  func.func @transform_2(%arg0: i32, %arg1: i32) -> (i32, i32) {
    %c0_i32 = arith.constant 0 : i32
    %c0_i32_0 = arith.constant 0 : i32
    return %arg0, %c0_i32 : i32, i32
  }
}

</mosaic_0001>

<bundles_post_ra>
// kernel: tpu_custom_call.1
= control target key start
LH: loop header
LB: loop body
LE: loop exit
PB: predicated region body
PF: predicated region fallthrough
CT: control target
= control target key end

     0   :  { %7 = vsyncpa [#allocation6], 0  ;;  %s180_s0 = inlined_call_operand.hbm [shape: f32[8,32], index: 0, kind: input, shape index: {}]   ;;  %s181_s1 = inlined_call_operand.hbm [shape: f32[8,32], index: 1, kind: input, shape index: {}]   ;;  %s182_s2 = inlined_call_operand.vmem [shape: f32[8,1], index: 2, kind: output, shape index: {}]  }
   0x1   :  { %8 = vsyncpa [#allocation8], 0  ;;  %s144_s9 = smov [#allocation5]   ;;  %s145_s11 = smov [#allocation7]  }
   0x2   :  { %s15_s10 = sshll.u32 %s144_s9, 4  ;;  %s25_s12 = sshll.u32 %s145_s11, 4  ;;  %s16_s10 = int_to_ptr.vmem [resolvable:$true] %s15_s10  ;;  %s26_s12 = int_to_ptr.vmem [resolvable:$true] %s25_s12 }
   0x3   :  { %s108_s13 = scalar_lea.vmem %s16_s10, 128  ;;  %p113_p1 = scmp.lt.s32.totalorder %s16_s10, %s16_s10 }
   0x4   :  { %p109_p0 = scmp.ne.s32.totalorder %s16_s10, %s108_s13  ;;  %p114_p2 = scmp.lt.s32.totalorder %s108_s13, %s108_s13 }
   0x6   :  { %p115_p3 = por %p114_p2, %p113_p1 }
   0x8   :  { %p116_p4 = pnand %p115_p3, %p109_p0 }
   0xa   :  { %119 = shalt.err (!%p116_p4)
}
   0xb   :  { %18 = dma.hbm_to_vmem [thread:$0]  %s180_s0, 128, %s16_s10, [#allocation6]  }
   0xc   :  { %s128_s16 = scalar_lea.vmem %s26_s12, 128  ;;  %p133_p6 = scmp.lt.s32.totalorder %s26_s12, %s26_s12 }
   0xd   :  { %p129_p5 = scmp.ne.s32.totalorder %s26_s12, %s128_s16  ;;  %p134_p7 = scmp.lt.s32.totalorder %s128_s16, %s128_s16 }
   0xf   :  { %p135_p8 = por %p134_p7, %p133_p6 }
  0x11   :  { %p136_p9 = pnand %p135_p8, %p129_p5 }
  0x13   :  { %139 = shalt.err (!%p136_p9)
}
  0x14   :  { %28 = dma.hbm_to_vmem [thread:$0]  %s181_s1, 128, %s26_s12, [#allocation8]  }
  0x15   :  { %140 = dma.done.wait [#allocation6], 128  }
  0x16   :  { %141 = vsyncadd [#allocation6], 4294967168 }
  0x17   :  { %142 = dma.done.wait [#allocation8], 128  }
  0x18   :  { %143 = vsyncadd [#allocation8], 4294967168  ;;  %vm39_vm0 = vcmask 261120   ;;  %v146_v0 = vmov 0.0   ;;  %v43_v1 = vld [vmem:[#allocation5] sm:$0xff]  ;;  %v44_v2 = vld [vmem:[#allocation7] sm:$0xff] }
  0x19   :  { %41 = vst.msk [vmem:[#allocation3] sm:$0xff] %vm39_vm0, %v146_v0  ;;  %40 = vst.msk [vmem:[#allocation2] sm:$0xff] %vm39_vm0, %v146_v0  ;;  %v46_v3 = vmul.f32 %v43_v1, %v43_v1  ;;  %v47_v5 = vmul.f32 %v44_v2, %v44_v2  ;;  %v45_v7 = vmul.f32 %v44_v2, %v43_v1  ;;  %vm85_vm3 = vcmask 7168  }
  0x1a   :  { %42 = vst.msk [vmem:[#allocation4] sm:$0xff] %vm39_vm0, %v146_v0 }
  0x20   :  { %v52_v4 = vld [vmem:[#allocation3] sm:$0xff]  ;;  %v48_v8 = vld [vmem:[#allocation2] sm:$0xff] }
  0x21   :  { %v55_v6 = vld [vmem:[#allocation4] sm:$0xff]  ;;  %v53_v9 = vadd.f32 %v52_v4, %v46_v3  ;;  %v49_v11 = vadd.f32 %v48_v8, %v45_v7 }
  0x22   :  { %v56_v10 = vadd.f32 %v55_v6, %v47_v5 }
  0x23   :  { %54 = vst.msk [vmem:[#allocation3] sm:$0xff] %vm39_vm0, %v53_v9  ;;  %51 = vst.msk [vmem:[#allocation2] sm:$0xff] %vm39_vm0, %v49_v11 }
  0x24   :  { %57 = vst.msk [vmem:[#allocation4] sm:$0xff] %vm39_vm0, %v56_v10 }
  0x2a   :  { %v65_v12 = vld [vmem:[#allocation3] sm:$0xff]  ;;  %v61_v14 = vld [vmem:[#allocation2] sm:$0xff] }
  0x2b   :  { %v69_v13 = vld [vmem:[#allocation4] sm:$0xff]  ;;  %v66_v15 = vsel %vm39_vm0, %v65_v12, 0.0  ;;  %v62_v16 = vsel %vm39_vm0, %v61_v14, 0.0 }
  0x2c   :  { %67 = vadd.xlane.f32.xlu0 %v66_v15  ;;  %63 = vadd.xlane.f32.xlu1 %v62_v16  ;;  %v70_v17 = vsel %vm39_vm0, %v69_v13, 0.0 }
  0x30   :  { %71 = vadd.xlane.f32.xlu0 %v70_v17 }
  0xb5   :  { %v68_v18 = vpop.xlane.xlu0 %67  ;;  %v64_v27 = vpop.xlane.xlu1 %63 }
  0xb9   :  { %v72_v19 = vpop.xlane.xlu0 %71 }
  0xba   :  { %v73_v20 = vmul.f32 %v72_v19, %v68_v18 }
  0xbc   :  { %96 = vrsqrt.f32 %v73_v20  ;;  %vm76_vm1 = vcmp.eq.f32.partialorder %v73_v20, inf  ;;  %v79_v23 = vand.u32 2147483648, %v73_v20  ;;  %vm78_vm2 = vcmp.eq.f32.partialorder %v73_v20, 0.0 }
  0xc9   :  { %v97_v21 = vpop.eup %96 }
  0xca   :  { %v75_v22 = vmul.f32 %v97_v21, %v73_v20 }
  0xcc   :  { %v77_v24 = vsel %vm76_vm1, %v73_v20, %v75_v22 }
  0xcd   :  { %v80_v25 = vsel %vm78_vm2, %v79_v23, %v77_v24 }
  0xce   :  { %v81_v26 = vmax.f32 %v80_v25, 1e-08 }
  0xd0   :  { %98 = vrcp.f32 %v81_v26 }
  0xdd   :  { %v99_v28 = vpop.eup %98 }
  0xde   :  { %v83_v29 = vmul.f32 %v99_v28, %v64_v27 }
  0xe0   :  { %v84_v30 = vsub.f32 1.0, %v83_v29 }
  0xe2   :  { %86 = vst.msk [vmem:[%s182_s2] sm:$0xff] %vm85_vm3, %v84_v30 }
  0xe3   :  { %91 = vsyncpa [#allocation6], 1 }
  0xe4   :  { %92 = vsyncpa [#allocation8], 1 }

</bundles_post_ra>
